<compile_context>
chip_gen: v5e
topology: v5e:2x2
jax: 0.10.0
libtpu: 0.0.40
codegen_flags: <defaults>
</compile_context>

<pallas_src>
import functools

import jax
import jax.numpy as jnp
from jax.experimental import pallas as pl
from jax.experimental.pallas import tpu as pltpu

ALPHA = 0.7
TEMP = 1.0
_LANE = 128


def _loss_kernel(pred_ref, true_ref, out_ref, acc_em, acc_t, acc_c,
                 *, n_batch, n_comp):
    """One grid step: per-lane partial sums for the three loss terms.

    pred_ref / true_ref : VMEM tile [C+1, TB]  (row 0 = total, batch on lanes)
    out_ref             : VMEM block [1, 128]  (per-core partial loss in lane 0)
    acc_em/acc_t/acc_c  : VMEM (1, TB) f32     (per-lane running sums)
    """
    c = pl.program_id(0)
    i = pl.program_id(1)
    n_inner = pl.num_programs(1)
    tb = pred_ref.shape[1]

    @pl.when(i == 0)
    def _init():
        acc_em[...] = jnp.zeros_like(acc_em)
        acc_t[...] = jnp.zeros_like(acc_t)
        acc_c[...] = jnp.zeros_like(acc_c)

    pred = pred_ref[...].astype(jnp.float32)        # [W, TB]
    true = true_ref[...].astype(jnp.float32)        # [W, TB]

    # Lane mask: kills ragged-tail lanes and phantom tiles (no jnp.pad pass).
    tile_idx = c * n_inner + i
    lane = jax.lax.broadcasted_iota(jnp.int32, (1, tb), 1)
    mask = (tile_idx * tb + lane) < n_batch          # [1, TB] bool

    # MSE partial sums (whole-tile diff; only row 0 — sublane-aligned — sliced).
    d = pred - true
    dsq = d * d
    d_t_sq = dsq[0:1, :]                                              # [1, TB]
    em_sq = jnp.sum(dsq, axis=0, keepdims=True) - d_t_sq              # [1, TB]

    # Physics consistency: |pred_total - sum_j pred_emissions| / (|pred_total| + temp)
    pt = pred[0:1, :]                                                 # [1, TB]
    sum_em = jnp.sum(pred, axis=0, keepdims=True) - pt                # [1, TB]
    inv_den = pl.reciprocal(jnp.abs(pt) + TEMP, approx=False)         # exact
    cons = jnp.abs(pt - sum_em) * inv_den                             # [1, TB]

    # Pure per-lane VPU accumulation (no cross-lane reduce in the hot loop).
    acc_em[...] += jnp.where(mask, em_sq, 0.0)
    acc_t[...] += jnp.where(mask, d_t_sq, 0.0)
    acc_c[...] += jnp.where(mask, cons, 0.0)

    @pl.when(i == n_inner - 1)
    def _finalize():
        em_sum = jnp.sum(acc_em[...])
        t_sum = jnp.sum(acc_t[...])
        c_sum = jnp.sum(acc_c[...])
        partial = ((1.0 - ALPHA) * em_sum * (1.0 / float(n_batch * n_comp))
                   + ALPHA * t_sum * (1.0 / float(n_batch))
                   + c_sum * (1.0 / float(n_batch)))
        out_lane = jax.lax.broadcasted_iota(jnp.int32, (1, out_ref.shape[1]), 1)
        out_ref[...] = jnp.where(out_lane == 0, partial, 0.0).astype(jnp.float32)


def _choose_tile_lanes(batch, width, itemsize):
    # ~4 MiB per slab tile -> ~8 MiB of DMA per grid step; two slabs
    # double-buffered ≈ 16 MiB plus accumulators/temporaries stays under the
    # 40 MiB scoped limit and v7x's 64 MiB physical VMEM, while amortizing the
    # ~0.35 us per-grid-step overhead to a few percent of DMA time.
    target_bytes = 4 * 1024 * 1024
    tb = (target_bytes // (width * itemsize)) // _LANE * _LANE
    tb = max(int(tb), _LANE)
    if batch <= tb:
        # Single tile: block shape equals the full array, no 128-multiple rule.
        return batch
    return tb


def physics_constrained_loss(pred_emissions, pred_total,
                             true_emissions, true_total,
                             *, tile_lanes=None):
    B, C = pred_emissions.shape
    W = C + 1

    pt = pred_total.reshape(B, 1)
    tt = true_total.reshape(B, 1)
    # Two lane-dense slabs (batch on lanes), total row FIRST so the only
    # in-kernel row slice starts at sublane 0.
    pred_slab = jnp.concatenate([pt, pred_emissions], axis=1).T   # [W, B]
    true_slab = jnp.concatenate([tt, true_emissions], axis=1).T   # [W, B]

    if tile_lanes is None:
        tb = _choose_tile_lanes(B, W, pred_slab.dtype.itemsize)
    else:
        tb = int(tile_lanes)
        if tb < B and tb % _LANE != 0:
            raise ValueError("tile_lanes must be a multiple of 128 when tiling the batch")
        tb = min(tb, B)

    n_tiles = int(pl.cdiv(B, tb))
    # Leading "parallel" axis: shards batch tiles across v7x's two TensorCores.
    n_outer = 2 if n_tiles >= 2 else 1
    n_inner = int(pl.cdiv(n_tiles, n_outer))

    def slab_map(c, i):
        # Clamp phantom tiles (when n_tiles is odd) in-bounds; their lanes are
        # fully masked in the kernel so they contribute 0.
        return (0, jnp.minimum(c * n_inner + i, n_tiles - 1))

    kernel = functools.partial(_loss_kernel, n_batch=B, n_comp=C)

    partials = pl.pallas_call(
        kernel,
        out_shape=jax.ShapeDtypeStruct((n_outer, _LANE), jnp.float32),
        grid_spec=pltpu.PrefetchScalarGridSpec(
            num_scalar_prefetch=0,
            grid=(n_outer, n_inner),
            in_specs=[pl.BlockSpec((W, tb), slab_map),
                      pl.BlockSpec((W, tb), slab_map)],
            out_specs=pl.BlockSpec((1, _LANE), lambda c, i: (c, 0)),
            scratch_shapes=[pltpu.VMEM((1, tb), jnp.float32),
                            pltpu.VMEM((1, tb), jnp.float32),
                            pltpu.VMEM((1, tb), jnp.float32)],
        ),
        compiler_params=pltpu.CompilerParams(
            dimension_semantics=("parallel", "arbitrary"),
            vmem_limit_bytes=40 * 1024 * 1024,
        ),
    )(pred_slab, true_slab)

    # Each core's row holds its partial loss in lane 0 (zeros elsewhere).
    return jnp.sum(partials)


def _reference(pred_emissions, pred_total, true_emissions, true_total):
    emission_loss = jnp.mean((pred_emissions - true_emissions) ** 2)
    total_loss = jnp.mean((pred_total - true_total) ** 2)
    consistency = jnp.mean(
        jnp.abs(pred_total - jnp.sum(pred_emissions, axis=1, keepdims=True))
        / (jnp.abs(pred_total) + TEMP)
    )
    return (1.0 - ALPHA) * emission_loss + ALPHA * total_loss + consistency


if __name__ == "__main__":
    key = jax.random.PRNGKey(0)
    k1, k2, k3, k4 = jax.random.split(key, 4)

    # Small shapes consistent with the module: batch of 8, 4 emission components.
    B, C = 8, 4
    pred_emissions = jax.random.normal(k1, (B, C), dtype=jnp.float32)
    pred_total = jax.random.normal(k2, (B, 1), dtype=jnp.float32)
    true_emissions = jax.random.normal(k3, (B, C), dtype=jnp.float32)
    true_total = jax.random.normal(k4, (B, 1), dtype=jnp.float32)

    loss = physics_constrained_loss(pred_emissions, pred_total,
                                    true_emissions, true_total)
    loss = jax.block_until_ready(loss)
    ref = _reference(pred_emissions, pred_total, true_emissions, true_total)
    assert jnp.allclose(loss, ref, rtol=1e-5, atol=1e-5), (loss, ref)

    # Exercise the grid / per-lane accumulators / dual-core split / ragged-tail
    # mask / phantom-tile clamp (n_tiles=3 -> n_outer=2, n_inner=2).
    B2, C2 = 300, 4
    k5, k6, k7, k8 = jax.random.split(jax.random.PRNGKey(1), 4)
    pe2 = jax.random.normal(k5, (B2, C2), dtype=jnp.float32)
    pt2 = jax.random.normal(k6, (B2, 1), dtype=jnp.float32)
    te2 = jax.random.normal(k7, (B2, C2), dtype=jnp.float32)
    tt2 = jax.random.normal(k8, (B2, 1), dtype=jnp.float32)
    loss2 = jax.block_until_ready(
        physics_constrained_loss(pe2, pt2, te2, tt2, tile_lanes=128))
    ref2 = _reference(pe2, pt2, te2, tt2)
    assert jnp.allclose(loss2, ref2, rtol=1e-5, atol=1e-5), (loss2, ref2)

    # Even split across both outer shards (n_tiles=4 -> 2 tiles per shard).
    B3 = 512
    k9, k10, k11, k12 = jax.random.split(jax.random.PRNGKey(2), 4)
    pe3 = jax.random.normal(k9, (B3, C2), dtype=jnp.float32)
    pt3 = jax.random.normal(k10, (B3, 1), dtype=jnp.float32)
    te3 = jax.random.normal(k11, (B3, C2), dtype=jnp.float32)
    tt3 = jax.random.normal(k12, (B3, 1), dtype=jnp.float32)
    loss3 = jax.block_until_ready(
        physics_constrained_loss(pe3, pt3, te3, tt3, tile_lanes=128))
    ref3 = _reference(pe3, pt3, te3, tt3)
    assert jnp.allclose(loss3, ref3, rtol=1e-5, atol=1e-5), (loss3, ref3)

    print("KERNEL_OK")
</pallas_src>

<mosaic_0001>
module attributes {stable_mosaic.version = 11 : i64} {
  func.func @_loss_kernel(%arg0: i32, %arg1: i32, %arg2: memref<5x8xf32, #tpu.memory_space<vmem>>, %arg3: memref<5x8xf32, #tpu.memory_space<vmem>>, %arg4: memref<1x128xf32, #tpu.memory_space<vmem>>, %arg5: memref<1x8xf32, #tpu.memory_space<vmem>>, %arg6: memref<1x8xf32, #tpu.memory_space<vmem>>, %arg7: memref<1x8xf32, #tpu.memory_space<vmem>>) attributes {dimension_semantics = [#tpu.dimension_semantics<parallel>, #tpu.dimension_semantics<arbitrary>], iteration_bounds = array<i64: 1, 1>, scalar_prefetch = 0 : i64, scratch_operands = 3 : i64, tpu.core_type = #tpu.core_type<tc>, window_params = [{transform_indices = @transform_0, window_bounds = array<i64: 5, 8>}, {transform_indices = @transform_1, window_bounds = array<i64: 5, 8>}, {transform_indices = @transform_2, window_bounds = array<i64: 1, 128>}]} {
    %c0_i32 = arith.constant 0 : i32
    %0 = arith.cmpi eq, %arg1, %c0_i32 : i32
    %1 = arith.extui %0 : i1 to i32
    %c0_i32_0 = arith.constant 0 : i32
    %2 = arith.cmpi ne, %1, %c0_i32_0 : i32
    scf.if %2 {
      %cst_24 = arith.constant 0.000000e+00 : f32
      %48 = vector.broadcast %cst_24 : f32 to vector<1x8xf32>
      %c0_25 = arith.constant 0 : index
      %c0_26 = arith.constant 0 : index
      %49 = vector.load %arg5[%c0_25, %c0_26] : memref<1x8xf32, #tpu.memory_space<vmem>>, vector<1x8xf32>
      tpu.vector_store %arg5[%c0_25, %c0_26], %48 {strides = array<i32>} : memref<1x8xf32, #tpu.memory_space<vmem>>, vector<1x8xf32>,
      %cst_27 = arith.constant 0.000000e+00 : f32
      %50 = vector.broadcast %cst_27 : f32 to vector<1x8xf32>
      %c0_28 = arith.constant 0 : index
      %c0_29 = arith.constant 0 : index
      %51 = vector.load %arg6[%c0_28, %c0_29] : memref<1x8xf32, #tpu.memory_space<vmem>>, vector<1x8xf32>
      tpu.vector_store %arg6[%c0_28, %c0_29], %50 {strides = array<i32>} : memref<1x8xf32, #tpu.memory_space<vmem>>, vector<1x8xf32>,
      %cst_30 = arith.constant 0.000000e+00 : f32
      %52 = vector.broadcast %cst_30 : f32 to vector<1x8xf32>
      %c0_31 = arith.constant 0 : index
      %c0_32 = arith.constant 0 : index
      %53 = vector.load %arg7[%c0_31, %c0_32] : memref<1x8xf32, #tpu.memory_space<vmem>>, vector<1x8xf32>
      tpu.vector_store %arg7[%c0_31, %c0_32], %52 {strides = array<i32>} : memref<1x8xf32, #tpu.memory_space<vmem>>, vector<1x8xf32>,
    } else {
    }
    %c0 = arith.constant 0 : index
    %c0_1 = arith.constant 0 : index
    %3 = vector.load %arg2[%c0, %c0_1] : memref<5x8xf32, #tpu.memory_space<vmem>>, vector<5x8xf32>
    %c0_2 = arith.constant 0 : index
    %c0_3 = arith.constant 0 : index
    %4 = vector.load %arg3[%c0_2, %c0_3] : memref<5x8xf32, #tpu.memory_space<vmem>>, vector<5x8xf32>
    %c1_i32 = arith.constant 1 : i32
    %5 = arith.muli %arg0, %c1_i32 : i32
    %6 = arith.addi %5, %arg1 : i32
    %7 = tpu.iota {dimensions = array<i32: 1>} : vector<1x8xi32>
    %c8_i32 = arith.constant 8 : i32
    %8 = arith.muli %6, %c8_i32 : i32
    %9 = vector.broadcast %8 : i32 to vector<1x8xi32>
    %10 = arith.addi %9, %7 : vector<1x8xi32>
    %c8_i32_4 = arith.constant 8 : i32
    %11 = vector.broadcast %c8_i32_4 : i32 to vector<1x8xi32>
    %12 = arith.cmpi slt, %10, %11 : vector<1x8xi32>
    %13 = arith.subf %3, %4 : vector<5x8xf32>
    %14 = arith.mulf %13, %13 : vector<5x8xf32>
    %15 = vector.extract_strided_slice %14 {offsets = [0, 0], sizes = [1, 8], strides = [1, 1]} : vector<5x8xf32> to vector<1x8xf32>
    %cst = arith.constant dense<0.000000e+00> : vector<8xf32>
    %16 = vector.multi_reduction <add>, %14, %cst [0] : vector<5x8xf32> to vector<8xf32>
    %17 = vector.shape_cast %16 : vector<8xf32> to vector<1x8xf32>
    %18 = arith.subf %17, %15 : vector<1x8xf32>
    %19 = vector.extract_strided_slice %3 {offsets = [0, 0], sizes = [1, 8], strides = [1, 1]} : vector<5x8xf32> to vector<1x8xf32>
    %cst_5 = arith.constant dense<0.000000e+00> : vector<8xf32>
    %20 = vector.multi_reduction <add>, %3, %cst_5 [0] : vector<5x8xf32> to vector<8xf32>
    %21 = vector.shape_cast %20 : vector<8xf32> to vector<1x8xf32>
    %22 = arith.subf %21, %19 : vector<1x8xf32>
    %23 = math.absf %19 : vector<1x8xf32>
    %cst_6 = arith.constant 1.000000e+00 : f32
    %24 = vector.broadcast %cst_6 : f32 to vector<1x8xf32>
    %25 = arith.addf %23, %24 : vector<1x8xf32>
    %26 = tpu.reciprocal %25 : vector<1x8xf32> -> vector<1x8xf32>
    %27 = arith.subf %19, %22 : vector<1x8xf32>
    %28 = math.absf %27 : vector<1x8xf32>
    %29 = arith.mulf %28, %26 : vector<1x8xf32>
    %c0_7 = arith.constant 0 : index
    %c0_8 = arith.constant 0 : index
    %30 = vector.load %arg5[%c0_7, %c0_8] : memref<1x8xf32, #tpu.memory_space<vmem>>, vector<1x8xf32>
    %cst_9 = arith.constant 0.000000e+00 : f32
    %31 = vector.broadcast %cst_9 : f32 to vector<1x8xf32>
    %32 = arith.select %12, %18, %31 : vector<1x8xi1>, vector<1x8xf32>
    %33 = arith.addf %30, %32 : vector<1x8xf32>
    %c0_10 = arith.constant 0 : index
    %c0_11 = arith.constant 0 : index
    %34 = vector.load %arg5[%c0_10, %c0_11] : memref<1x8xf32, #tpu.memory_space<vmem>>, vector<1x8xf32>
    tpu.vector_store %arg5[%c0_10, %c0_11], %33 {strides = array<i32>} : memref<1x8xf32, #tpu.memory_space<vmem>>, vector<1x8xf32>,
    %c0_12 = arith.constant 0 : index
    %c0_13 = arith.constant 0 : index
    %35 = vector.load %arg6[%c0_12, %c0_13] : memref<1x8xf32, #tpu.memory_space<vmem>>, vector<1x8xf32>
    %cst_14 = arith.constant 0.000000e+00 : f32
    %36 = vector.broadcast %cst_14 : f32 to vector<1x8xf32>
    %37 = arith.select %12, %15, %36 : vector<1x8xi1>, vector<1x8xf32>
    %38 = arith.addf %35, %37 : vector<1x8xf32>
    %c0_15 = arith.constant 0 : index
    %c0_16 = arith.constant 0 : index
    %39 = vector.load %arg6[%c0_15, %c0_16] : memref<1x8xf32, #tpu.memory_space<vmem>>, vector<1x8xf32>
    tpu.vector_store %arg6[%c0_15, %c0_16], %38 {strides = array<i32>} : memref<1x8xf32, #tpu.memory_space<vmem>>, vector<1x8xf32>,
    %c0_17 = arith.constant 0 : index
    %c0_18 = arith.constant 0 : index
    %40 = vector.load %arg7[%c0_17, %c0_18] : memref<1x8xf32, #tpu.memory_space<vmem>>, vector<1x8xf32>
    %cst_19 = arith.constant 0.000000e+00 : f32
    %41 = vector.broadcast %cst_19 : f32 to vector<1x8xf32>
    %42 = arith.select %12, %29, %41 : vector<1x8xi1>, vector<1x8xf32>
    %43 = arith.addf %40, %42 : vector<1x8xf32>
    %c0_20 = arith.constant 0 : index
    %c0_21 = arith.constant 0 : index
    %44 = vector.load %arg7[%c0_20, %c0_21] : memref<1x8xf32, #tpu.memory_space<vmem>>, vector<1x8xf32>
    tpu.vector_store %arg7[%c0_20, %c0_21], %43 {strides = array<i32>} : memref<1x8xf32, #tpu.memory_space<vmem>>, vector<1x8xf32>,
    %c0_i32_22 = arith.constant 0 : i32
    %45 = arith.cmpi eq, %arg1, %c0_i32_22 : i32
    %46 = arith.extui %45 : i1 to i32
    %c0_i32_23 = arith.constant 0 : i32
    %47 = arith.cmpi ne, %46, %c0_i32_23 : i32
    scf.if %47 {
      %c0_24 = arith.constant 0 : index
      %c0_25 = arith.constant 0 : index
      %48 = vector.load %arg5[%c0_24, %c0_25] : memref<1x8xf32, #tpu.memory_space<vmem>>, vector<1x8xf32>
      %49 = vector.shape_cast %48 : vector<1x8xf32> to vector<1x1x8xf32>
      %cst_26 = arith.constant dense<0.000000e+00> : vector<1xf32>
      %50 = vector.multi_reduction <add>, %49, %cst_26 [1, 2] : vector<1x1x8xf32> to vector<1xf32>
      %51 = vector.shape_cast %50 : vector<1xf32> to vector<1x1x1xf32>
      %52 = vector.extract %51[0, 0, 0] : f32 from vector<1x1x1xf32>
      %c0_27 = arith.constant 0 : index
      %c0_28 = arith.constant 0 : index
      %53 = vector.load %arg6[%c0_27, %c0_28] : memref<1x8xf32, #tpu.memory_space<vmem>>, vector<1x8xf32>
      %54 = vector.shape_cast %53 : vector<1x8xf32> to vector<1x1x8xf32>
      %cst_29 = arith.constant dense<0.000000e+00> : vector<1xf32>
      %55 = vector.multi_reduction <add>, %54, %cst_29 [1, 2] : vector<1x1x8xf32> to vector<1xf32>
      %56 = vector.shape_cast %55 : vector<1xf32> to vector<1x1x1xf32>
      %57 = vector.extract %56[0, 0, 0] : f32 from vector<1x1x1xf32>
      %c0_30 = arith.constant 0 : index
      %c0_31 = arith.constant 0 : index
      %58 = vector.load %arg7[%c0_30, %c0_31] : memref<1x8xf32, #tpu.memory_space<vmem>>, vector<1x8xf32>
      %59 = vector.shape_cast %58 : vector<1x8xf32> to vector<1x1x8xf32>
      %cst_32 = arith.constant dense<0.000000e+00> : vector<1xf32>
      %60 = vector.multi_reduction <add>, %59, %cst_32 [1, 2] : vector<1x1x8xf32> to vector<1xf32>
      %61 = vector.shape_cast %60 : vector<1xf32> to vector<1x1x1xf32>
      %62 = vector.extract %61[0, 0, 0] : f32 from vector<1x1x1xf32>
      %cst_33 = arith.constant 3.000000e-01 : f32
      %63 = arith.mulf %cst_33, %52 : f32
      %cst_34 = arith.constant 3.125000e-02 : f32
      %64 = arith.mulf %63, %cst_34 : f32
      %cst_35 = arith.constant 0.699999988 : f32
      %65 = arith.mulf %cst_35, %57 : f32
      %cst_36 = arith.constant 1.250000e-01 : f32
      %66 = arith.mulf %65, %cst_36 : f32
      %67 = arith.addf %64, %66 : f32
      %cst_37 = arith.constant 1.250000e-01 : f32
      %68 = arith.mulf %62, %cst_37 : f32
      %69 = arith.addf %67, %68 : f32
      %70 = tpu.iota {dimensions = array<i32: 1>} : vector<1x128xi32>
      %c0_i32_38 = arith.constant 0 : i32
      %71 = vector.broadcast %c0_i32_38 : i32 to vector<1x128xi32>
      %72 = arith.cmpi eq, %70, %71 : vector<1x128xi32>
      %cst_39 = arith.constant 0.000000e+00 : f32
      %73 = vector.broadcast %69 : f32 to vector<1x128xf32>
      %74 = vector.broadcast %cst_39 : f32 to vector<1x128xf32>
      %75 = arith.select %72, %73, %74 : vector<1x128xi1>, vector<1x128xf32>
      %c0_40 = arith.constant 0 : index
      %c0_41 = arith.constant 0 : index
      %76 = vector.load %arg4[%c0_40, %c0_41] : memref<1x128xf32, #tpu.memory_space<vmem>>, vector<1x128xf32>
      tpu.vector_store %arg4[%c0_40, %c0_41], %75 {strides = array<i32>} : memref<1x128xf32, #tpu.memory_space<vmem>>, vector<1x128xf32>,
    } else {
    }
    return
  }
  func.func @transform_0(%arg0: i32, %arg1: i32) -> (i32, i32) {
    %c1_i32 = arith.constant 1 : i32
    %0 = arith.muli %arg0, %c1_i32 : i32
    %1 = arith.addi %0, %arg1 : i32
    %c0_i32 = arith.constant 0 : i32
    %2 = arith.minsi %1, %c0_i32 : i32
    %c0_i32_0 = arith.constant 0 : i32
    %c0_i32_1 = arith.constant 0 : i32
    return %c0_i32_0, %2 : i32, i32
  }
  func.func @transform_1(%arg0: i32, %arg1: i32) -> (i32, i32) {
    %c1_i32 = arith.constant 1 : i32
    %0 = arith.muli %arg0, %c1_i32 : i32
    %1 = arith.addi %0, %arg1 : i32
    %c0_i32 = arith.constant 0 : i32
    %2 = arith.minsi %1, %c0_i32 : i32
    %c0_i32_0 = arith.constant 0 : i32
    %c0_i32_1 = arith.constant 0 : i32
    return %c0_i32_0, %2 : i32, i32
  }
  func.func @transform_2(%arg0: i32, %arg1: i32) -> (i32, i32) {
    %c0_i32 = arith.constant 0 : i32
    %c0_i32_0 = arith.constant 0 : i32
    return %arg0, %c0_i32 : i32, i32
  }
}

</mosaic_0001>

<bundles_post_ra>
// kernel: tpu_custom_call.1
= control target key start
LH: loop header
LB: loop body
LE: loop exit
PB: predicated region body
PF: predicated region fallthrough
CT: control target
= control target key end

     0   :  { %7 = vsyncpa [#allocation6], 0  ;;  %s330_s0 = inlined_call_operand.hbm [shape: f32[5,8], index: 0, kind: input, shape index: {}]   ;;  %s331_s1 = inlined_call_operand.hbm [shape: f32[5,8], index: 1, kind: input, shape index: {}]   ;;  %s332_s2 = inlined_call_operand.hbm [shape: f32[1,128], index: 2, kind: output, shape index: {}]  }
   0x1   :  { %8 = vsyncpa [#allocation9], 0 }
   0x2   :  { %9 = vsyncpa [#allocation7], 0  ;;  %s20_s11 = sshll.u32 %s330_s0, 4  ;;  %s283_s12 = smov [#allocation5]   ;;  %s21_s11 = int_to_ptr.hbm [resolvable:$true] %s20_s11 }
   0x3   :  { %s22_s13 = sshll.u32 %s283_s12, 4  ;;  %s36_s16 = sshll.u32 %s331_s1, 4  ;;  %s23_s13 = int_to_ptr.vmem [resolvable:$true] %s22_s13  ;;  %s37_s16 = int_to_ptr.hbm [resolvable:$true] %s36_s16 }
   0x4   :  { %25 = dma.hbm_to_vmem [thread:$0]  %s21_s11, 128, %s23_s13, [#allocation6]  }
   0x5   :  { %s284_s17 = smov [#allocation8]  }
   0x6   :  { %s38_s18 = sshll.u32 %s284_s17, 4  ;;  %s39_s18 = int_to_ptr.vmem [resolvable:$true] %s38_s18 }
   0x7   :  { %41 = dma.hbm_to_vmem [thread:$0]  %s37_s16, 128, %s39_s18, [#allocation9]  }
   0x8   :  { %277 = dma.done.wait [#allocation6], 128  }
   0x9   :  { %278 = vsyncadd [#allocation6], 4294967168 }
   0xa   :  { %279 = dma.done.wait [#allocation9], 128  }
   0xb   :  { %280 = vsyncadd [#allocation9], 4294967168  ;;  %vm60_vm0 = vcmask 57344   ;;  %v285_v0 = vmov 0.0   ;;  %v67_v1 = vlaneseq  ;;  %vm75_vm1 = vcmask 61440   ;;  %s286_s26 = smov [#allocation10]  }
   0xc   :  { %61 = vst.msk [vmem:[#allocation2] sm:$0x1] %vm60_vm0, %v285_v0  ;;  %v64_v2 = vld [vmem:[#allocation5] sm:$0x1f]  ;;  %v65_v3 = vld [vmem:[#allocation8] sm:$0x1f] }
   0xd   :  { %62 = vst.msk [vmem:[#allocation3] sm:$0x1] %vm60_vm0, %v285_v0  ;;  %v311_v4 = vand.u32 127, %v67_v1  ;;  %v73_v5 = vsub.f32 %v64_v2, %v65_v3  ;;  %v84_v6 = vsel %vm75_vm1, %v64_v2, 0.0  ;;  %v92_v7 = vand.u32 2147483647, %v64_v2 }
   0xe   :  { %63 = vst.msk [vmem:[#allocation4] sm:$0x1] %vm60_vm0, %v285_v0  ;;  %v85_v8 = vrot.slane %v84_v6, 4  ;;  %s176_s27 = sshll.u32 %s286_s26, 4  ;;  %s178_s30 = sshll.u32 %s332_s2, 4  ;;  %s177_s27 = int_to_ptr.vmem [resolvable:$true] %s176_s27  ;;  %s179_s30 = int_to_ptr.hbm [resolvable:$true] %s178_s30 }
   0xf   :  { %v74_v9 = vmul.f32 %v73_v5, %v73_v5  ;;  %v93_v10 = vadd.f32 1.0, %v92_v7  ;;  %vm72_vm2 = vcmp.lt.s32.totalorder %v311_v4, 8  ;;  %vm167_vm7 = vcmp.eq.s32.totalorder %v311_v4, 0 }
  0x10   :  { %v86_v11 = vadd.f32 %v85_v8, %v84_v6 }
  0x11   :  { %v76_v13 = vsel %vm75_vm1, %v74_v9, 0.0  ;;  %203 = vrcp.f32 %v93_v10  ;;  %v117_v16 = vsel %vm72_vm2, %v74_v9, 0.0  ;;  %vm99_vm3 = vweird.f32 %v93_v10 }
  0x12   :  { %v77_v14 = vrot.slane %v76_v13, 4  ;;  %v87_v15 = vrot.slane %v86_v11, 2  ;;  %v103_v26 = vand.u32 2147483647, %v93_v10  ;;  %v105_v27 = vand.u32 2147483648, %v93_v10 }
  0x13   :  { %v111_v36 = vld [vmem:[#allocation2] sm:$0x1] }
  0x14   :  { %v116_v12 = vld [vmem:[#allocation3] sm:$0x1]  ;;  %v78_v18 = vadd.f32 %v77_v14, %v76_v13  ;;  %v88_v19 = vadd.f32 %v87_v15, %v86_v11  ;;  %v106_v34 = vor.u32 1.1754944e-38, %v105_v27  ;;  %vm104_vm6 = vcmp.eq.f32.partialorder %v103_v26, 8.507059e+37 }
  0x15   :  { %v118_v17 = vadd.f32 %v117_v16, %v116_v12  ;;  %v120_v44 = vld [vmem:[#allocation4] sm:$0x1] }
  0x16   :  { %v79_v20 = vrot.slane %v78_v18, 2  ;;  %v89_v21 = vrot.slane %v88_v19, 1 }
  0x17   :  { %119 = vst.msk [vmem:[#allocation3] sm:$0x1] %vm60_vm0, %v118_v17  ;;  %v204_v22 = vpop.eup %203 }
  0x18   :  { %v80_v23 = vadd.f32 %v79_v20, %v78_v18  ;;  %v90_v24 = vadd.f32 %v89_v21, %v88_v19  ;;  %v95_v25 = vmul.f32 %v204_v22, %v93_v10  ;;  %vm100_vm4 = vweird.f32 %v204_v22 }
  0x19   :  { %vm101_vm5 = vmor %vm99_vm3, %vm100_vm4 }
  0x1a   :  { %v81_v28 = vrot.slane %v80_v23, 1  ;;  %v91_v29 = vsub.f32 %v90_v24, %v64_v2  ;;  %v96_v30 = vsub.f32 1.0, %v95_v25 }
  0x1c   :  { %v82_v31 = vadd.f32 %v81_v28, %v80_v23  ;;  %v97_v32 = vmul.f32 %v204_v22, %v96_v30  ;;  %v108_v33 = vsub.f32 %v64_v2, %v91_v29 }
  0x1e   :  { %v83_v35 = vsub.f32 %v82_v31, %v74_v9  ;;  %v98_v37 = vadd.f32 %v204_v22, %v97_v32  ;;  %v109_v38 = vand.u32 2147483647, %v108_v33  ;;  %v138_v50 = vld [vmem:[#allocation3] sm:$0x1] }
  0x1f   :  { %v139_v52 = vsel %vm60_vm0, %v138_v50, 0.0 }
  0x20   :  { %v112_v39 = vsel %vm72_vm2, %v83_v35, 0.0  ;;  %v102_v40 = vsel %vm101_vm5, %v204_v22, %v98_v37 }
  0x21   :  { %v113_v41 = vadd.f32 %v112_v39, %v111_v36  ;;  %v107_v42 = vsel %vm104_vm6, %v106_v34, %v102_v40 }
  0x22   :  { %v110_v43 = vmul.f32 %v109_v38, %v107_v42 }
  0x23   :  { %115 = vst.msk [vmem:[#allocation2] sm:$0x1] %vm60_vm0, %v113_v41 }
  0x24   :  { %v121_v45 = vsel %vm72_vm2, %v110_v43, 0.0 }
  0x25   :  { %v122_v46 = vadd.f32 %v121_v45, %v120_v44 }
  0x27   :  { %123 = vst.msk [vmem:[#allocation4] sm:$0x1] %vm60_vm0, %v122_v46 }
  0x2a   :  { %v127_v47 = vld [vmem:[#allocation2] sm:$0x1] }
  0x2b   :  { %v128_v48 = vsel %vm60_vm0, %v127_v47, 0.0 }
  0x2c   :  { %129 = vadd.xlane.f32.xlu0 %v128_v48 }
  0x2e   :  { %v149_v49 = vld [vmem:[#allocation4] sm:$0x1] }
  0x2f   :  { %v150_v51 = vsel %vm60_vm0, %v149_v49, 0.0 }
  0x30   :  { %151 = vadd.xlane.f32.xlu1 %v150_v51 }
  0x34   :  { %140 = vadd.xlane.f32.xlu0 %v139_v52 }
  0x9f   :  { %v130_v53 = vpop.xlane.xlu0 %129 }
  0xa0   :  { %v131_v54 = vrot.slane %v130_v53, 4 }
  0xa2   :  { %v132_v55 = vadd.f32 %v131_v54, %v130_v53 }
  0xa3   :  { %v152_v56 = vpop.xlane.xlu1 %151 }
  0xa4   :  { %v133_v57 = vrot.slane %v132_v55, 2  ;;  %v153_v58 = vrot.slane %v152_v56, 4 }
  0xa6   :  { %v154_v59 = vadd.f32 %v153_v58, %v152_v56  ;;  %v134_v60 = vadd.f32 %v133_v57, %v132_v55 }
  0xa7   :  { %v141_v61 = vpop.xlane.xlu0 %140 }
  0xa8   :  { %v155_v62 = vrot.slane %v154_v59, 2  ;;  %v142_v63 = vrot.slane %v141_v61, 4  ;;  %v135_v0 = vrot.slane %v134_v60, 1 }
  0xaa   :  { %v143_v1 = vadd.f32 %v142_v63, %v141_v61  ;;  %v136_v2 = vadd.f32 %v135_v0, %v134_v60  ;;  %v156_v3 = vadd.f32 %v155_v62, %v154_v59 }
  0xac   :  { %v144_v5 = vrot.slane %v143_v1, 2  ;;  %193 = vpush %v136_v2  ;;  %v157_v7 = vrot.slane %v156_v3, 1 }
  0xae   :  { %v145_v6 = vadd.f32 %v144_v5, %v143_v1  ;;  %v158_v10 = vadd.f32 %v157_v7, %v156_v3 }
  0xb0   :  { %v146_v8 = vrot.slane %v145_v6, 1 }
  0xb2   :  { %v147_v9 = vadd.f32 %v146_v8, %v145_v6 }
  0xb4   :  { %195 = vpush %v147_v9 }
  0xb5   :  { %197 = vpush %v158_v10 }
  0xdd   :  { %s194_s0 = spop %193 }
  0xde   :  { %s160_s1 = smul.f32 0.3, %s194_s0 }
  0xe0   :  { %s161_s21 = smul.f32 0.03125, %s160_s1 }
  0xe5   :  { %s196_s19 = spop %195 }
  0xe6   :  { %s162_s20 = smul.f32 0.7, %s196_s19  ;;  %s198_s22 = spop %197 }
  0xe7   :  { %s165_s25 = smul.f32 0.125, %s198_s22 }
  0xe8   :  { %s163_s23 = smul.f32 0.125, %s162_s20 }
  0xea   :  { %s164_s24 = sadd.f32 %s163_s23, %s161_s21 }
  0xec   :  { %s166_s3 = sadd.f32 %s165_s25, %s164_s24 }
  0xee   :  { %v168_v11 = vstv %s166_s3 }
  0xef   :  { %v169_v12 = vsel %vm167_vm7, %v168_v11, 0.0 }
  0xf0   :  { %170 = vst [vmem:[#allocation10] sm:$0x1] %v169_v12 }
  0xf1   :  { %181 = dma.vmem_to_hbm [thread:$0]  %s177_s27, 16, %s179_s30, [#allocation7]  }
  0xf2   :  { %281 = dma.done.wait [#allocation7], 16  }
  0xf3   :  { %282 = vsyncadd [#allocation7], 4294967280 }
  0xf4   :  { %186 = vsyncpa [#allocation6], 1 }
  0xf5   :  { %187 = vsyncpa [#allocation9], 1 }
  0xf6   :  { %188 = vsyncpa [#allocation7], 1 }

</bundles_post_ra>
